<compile_context>
chip_gen: v7x
topology: tpu7x:2x2x1
jax: 0.10.0
libtpu: 0.0.40
codegen_flags: <defaults>
</compile_context>

<pallas_src>
import jax
import jax.numpy as jnp
from jax import lax
from jax.experimental import pallas as pl
from jax.experimental.pallas import tpu as pltpu


def _round_up(n, m):
    return ((n + m - 1) // m) * m


def _vmem_capacity_bytes():
    # Generation-aware VMEM capacity; conservative fallback (v7x per-TC).
    try:
        return int(pltpu.get_tpu_info().vmem_capacity_bytes)
    except Exception:
        return 64 * 1024 * 1024


def gate_kernel(x_ref, w_ref, b_ref, o_ref):
    # x_ref: (tb, fdim), w_ref: (ne, fdim), b_ref: (1, ne), o_ref: (tb, ne)
    # Contract fdim of x against fdim of W (trans-B matmul on the MXU),
    # accumulate in f32.
    logits = lax.dot_general(
        x_ref[...], w_ref[...],
        dimension_numbers=(((1,), (1,)), ((), ())),
        preferred_element_type=jnp.float32,
    ) + b_ref[...].astype(jnp.float32)
    # Numerically-stable softmax over the expert (last) axis, in f32.
    m = jnp.max(logits, axis=-1, keepdims=True)
    e = jnp.exp(logits - m)
    s = jnp.sum(e, axis=-1, keepdims=True)
    # Exact normalization: rows must sum to 1 (gate weights feed a mixture).
    o_ref[...] = (e / s).astype(o_ref.dtype)


def gate_forward(x, w, b):
    """x: [B, fdim], w: [n_expert, fdim], b: [n_expert] -> [B, n_expert]."""
    B, fdim = x.shape
    n_expert = w.shape[0]
    in_dtype = x.dtype
    itemsize = jnp.dtype(in_dtype).itemsize
    sublane = 16 if itemsize == 2 else 8  # bf16 packs 2 rows per sublane

    # Lane-dense expert axis when the x read dominates (fdim >= 128):
    # zero-pad W rows and use a large negative bias for padded experts so
    # they get probability ~0; slice the output back below.
    ne_pad = n_expert
    if fdim >= 128 and (n_expert % 128) != 0:
        ne_pad = _round_up(n_expert, 128)
        w = jnp.pad(w, ((0, ne_pad - n_expert), (0, 0)))
        b = jnp.concatenate([
            b.astype(jnp.float32),
            jnp.full((ne_pad - n_expert,), -1e30, dtype=jnp.float32),
        ])
    b2 = b.reshape(1, ne_pad).astype(jnp.float32)

    # ---- batch-tile sizing: bandwidth-targeted and VMEM-budget aware ----
    vmem_cap = _vmem_capacity_bytes()
    budget = max(vmem_cap // 2, 16 * 1024 * 1024)
    target_x_tile_bytes = 4 * 1024 * 1024            # ~2-8 MiB/tile sweet spot

    fixed = ne_pad * fdim * itemsize + ne_pad * 4    # resident W + b
    stream_row = fdim * itemsize + ne_pad * itemsize  # double-buffered x + out
    temp_row = 4 * ne_pad * 4                         # f32 logits/exp temps

    tb = max(sublane, target_x_tile_bytes // max(1, fdim * itemsize))
    max_tb = max(sublane, (budget - fixed) // max(1, 2 * stream_row + temp_row))
    tb = min(tb, max_tb)
    tb = min(tb, _round_up(B, sublane))              # never exceed the batch
    if B >= 2 * sublane:
        # Keep >= 2 grid steps so v7x's two TensorCores both get work.
        tb = min(tb, _round_up(pl.cdiv(B, 2), sublane))
    tb = _round_up(max(tb, sublane), sublane)

    grid = (pl.cdiv(B, tb),)

    needed = fixed + tb * (2 * stream_row + temp_row) + (4 << 20)
    vmem_limit = int(min(max(32 * 1024 * 1024, needed),
                         vmem_cap - (8 << 20)))

    cost = pl.CostEstimate(
        flops=2 * B * fdim * ne_pad,
        transcendentals=B * ne_pad,
        bytes_accessed=(B * fdim * itemsize          # x read
                        + ne_pad * fdim * itemsize   # W read
                        + ne_pad * 4                 # b read
                        + B * ne_pad * itemsize),    # out write
    )

    out = pl.pallas_call(
        gate_kernel,
        out_shape=jax.ShapeDtypeStruct((B, ne_pad), in_dtype),
        grid_spec=pltpu.PrefetchScalarGridSpec(
            num_scalar_prefetch=0,
            grid=grid,
            in_specs=[
                pl.BlockSpec((tb, fdim), lambda i: (i, 0)),       # x stream
                pl.BlockSpec((ne_pad, fdim), lambda i: (0, 0)),   # W resident
                pl.BlockSpec((1, ne_pad), lambda i: (0, 0)),      # b resident
            ],
            out_specs=pl.BlockSpec((tb, ne_pad), lambda i: (i, 0)),
        ),
        compiler_params=pltpu.CompilerParams(
            dimension_semantics=("parallel",),
            vmem_limit_bytes=vmem_limit,
        ),
        cost_estimate=cost,
    )(x, w, b2)

    if ne_pad != n_expert:
        out = out[:, :n_expert]
    return out


if __name__ == "__main__":
    # Small shapes consistent with Gate(fdim, n_expert)
    batch, fdim, n_expert = 8, 32, 4

    key = jax.random.PRNGKey(0)
    kx, kw, kb = jax.random.split(key, 3)

    x = jax.random.normal(kx, (batch, fdim), dtype=jnp.float32)
    # Deterministic synthetic parameter init (mimics Linear's uniform bound)
    bound = 1.0 / (fdim ** 0.5)
    w = jax.random.uniform(kw, (n_expert, fdim), minval=-bound, maxval=bound,
                           dtype=jnp.float32)
    b = jax.random.uniform(kb, (n_expert,), minval=-bound, maxval=bound,
                           dtype=jnp.float32)

    out = jax.block_until_ready(gate_forward(x, w, b))
    ref = jax.nn.softmax(x @ w.T + b, axis=1)
    assert out.shape == (batch, n_expert)
    assert jnp.allclose(out, ref, atol=2e-3, rtol=2e-3)
    # Exact normalization -> rows sum to 1 to f32 precision.
    assert jnp.allclose(jnp.sum(out, axis=1), 1.0, atol=1e-4)

    # Multi-tile grid with a partial (masked) last block, no wrapper padding.
    batch2 = 37
    x2 = jax.random.normal(jax.random.PRNGKey(1), (batch2, fdim),
                           dtype=jnp.float32)
    out2 = jax.block_until_ready(gate_forward(x2, w, b))
    ref2 = jax.nn.softmax(x2 @ w.T + b, axis=1)
    assert out2.shape == (batch2, n_expert)
    assert jnp.allclose(out2, ref2, atol=2e-3, rtol=2e-3)
    assert jnp.allclose(jnp.sum(out2, axis=1), 1.0, atol=1e-4)

    # Lane-dense (expert axis padded to 128) path for larger fdim.
    fdim3 = 256
    kx3, kw3, kb3 = jax.random.split(jax.random.PRNGKey(2), 3)
    x3 = jax.random.normal(kx3, (16, fdim3), dtype=jnp.float32)
    bound3 = 1.0 / (fdim3 ** 0.5)
    w3 = jax.random.uniform(kw3, (n_expert, fdim3), minval=-bound3,
                            maxval=bound3, dtype=jnp.float32)
    b3 = jax.random.uniform(kb3, (n_expert,), minval=-bound3, maxval=bound3,
                            dtype=jnp.float32)
    out3 = jax.block_until_ready(gate_forward(x3, w3, b3))
    ref3 = jax.nn.softmax(x3 @ w3.T + b3, axis=1)
    assert out3.shape == (16, n_expert)
    assert jnp.allclose(out3, ref3, atol=2e-3, rtol=2e-3)
    assert jnp.allclose(jnp.sum(out3, axis=1), 1.0, atol=1e-4)

    print("KERNEL_OK")
</pallas_src>

<mosaic_0001>
module attributes {stable_mosaic.version = 11 : i64} {
  func.func @gate_kernel(%arg0: i32, %arg1: memref<8x32xf32, #tpu.memory_space<vmem>>, %arg2: memref<4x32xf32, #tpu.memory_space<vmem>>, %arg3: memref<1x4xf32, #tpu.memory_space<vmem>>, %arg4: memref<8x4xf32, #tpu.memory_space<vmem>>) attributes {dimension_semantics = [#tpu.dimension_semantics<parallel>], iteration_bounds = array<i64: 1>, scalar_prefetch = 0 : i64, scratch_operands = 0 : i64, tpu.core_type = #tpu.core_type<tc>, window_params = [{transform_indices = @transform_0, window_bounds = array<i64: 8, 32>}, {pipeline_mode = #tpu.pipeline_mode<synchronous>, transform_indices = @transform_1, window_bounds = array<i64: 4, 32>}, {pipeline_mode = #tpu.pipeline_mode<synchronous>, transform_indices = @transform_2, window_bounds = array<i64: 1, 4>}, {transform_indices = @transform_3, window_bounds = array<i64: 8, 4>}]} {
    %c0 = arith.constant 0 : index
    %c0_0 = arith.constant 0 : index
    %0 = vector.load %arg1[%c0, %c0_0] : memref<8x32xf32, #tpu.memory_space<vmem>>, vector<8x32xf32>
    %c0_1 = arith.constant 0 : index
    %c0_2 = arith.constant 0 : index
    %1 = vector.load %arg2[%c0_1, %c0_2] : memref<4x32xf32, #tpu.memory_space<vmem>>, vector<4x32xf32>
    %cst = arith.constant dense<0.000000e+00> : vector<8x4xf32>
    %2 = tpu.matmul %0, %1, %cst {dimension_numbers = #tpu.dot_dimension_numbers<[1], [1], [0], [0], [0, 0, 1, 0], [], []>} : vector<8x32xf32>, vector<4x32xf32>, vector<8x4xf32> -> vector<8x4xf32>
    %c0_3 = arith.constant 0 : index
    %c0_4 = arith.constant 0 : index
    %3 = vector.load %arg3[%c0_3, %c0_4] : memref<1x4xf32, #tpu.memory_space<vmem>>, vector<1x4xf32>
    %4 = vector.broadcast %3 : vector<1x4xf32> to vector<8x4xf32>
    %5 = arith.addf %2, %4 : vector<8x4xf32>
    %cst_5 = arith.constant dense<0xFF800000> : vector<8xf32>
    %6 = vector.multi_reduction <maximumf>, %5, %cst_5 [1] : vector<8x4xf32> to vector<8xf32>
    %7 = vector.shape_cast %6 : vector<8xf32> to vector<8x1xf32>
    %8 = vector.broadcast %7 : vector<8x1xf32> to vector<8x4xf32>
    %9 = arith.subf %5, %8 : vector<8x4xf32>
    %10 = math.exp %9 : vector<8x4xf32>
    %cst_6 = arith.constant dense<0.000000e+00> : vector<8xf32>
    %11 = vector.multi_reduction <add>, %10, %cst_6 [1] : vector<8x4xf32> to vector<8xf32>
    %12 = vector.shape_cast %11 : vector<8xf32> to vector<8x1xf32>
    %13 = vector.broadcast %12 : vector<8x1xf32> to vector<8x4xf32>
    %14 = arith.divf %10, %13 : vector<8x4xf32>
    %c0_7 = arith.constant 0 : index
    %c0_8 = arith.constant 0 : index
    %15 = vector.load %arg4[%c0_7, %c0_8] : memref<8x4xf32, #tpu.memory_space<vmem>>, vector<8x4xf32>
    tpu.vector_store %arg4[%c0_7, %c0_8], %14 {strides = array<i32>} : memref<8x4xf32, #tpu.memory_space<vmem>>, vector<8x4xf32>,
    return
  }
  func.func @transform_0(%arg0: i32) -> (i32, i32) {
    %c0_i32 = arith.constant 0 : i32
    %c0_i32_0 = arith.constant 0 : i32
    return %arg0, %c0_i32 : i32, i32
  }
  func.func @transform_1(%arg0: i32) -> (i32, i32) {
    %c0_i32 = arith.constant 0 : i32
    %c0_i32_0 = arith.constant 0 : i32
    %c0_i32_1 = arith.constant 0 : i32
    return %c0_i32, %c0_i32_0 : i32, i32
  }
  func.func @transform_2(%arg0: i32) -> (i32, i32) {
    %c0_i32 = arith.constant 0 : i32
    %c0_i32_0 = arith.constant 0 : i32
    %c0_i32_1 = arith.constant 0 : i32
    return %c0_i32, %c0_i32_0 : i32, i32
  }
  func.func @transform_3(%arg0: i32) -> (i32, i32) {
    %c0_i32 = arith.constant 0 : i32
    %c0_i32_0 = arith.constant 0 : i32
    return %arg0, %c0_i32 : i32, i32
  }
}

</mosaic_0001>

<bundles_post_ra>
// kernel: tpu_custom_call.1
= control target key start
LH: loop header
LB: loop body
LE: loop exit
PB: predicated region body
PF: predicated region fallthrough
CT: control target
= control target key end

     0   :  { %8 = vsyncpa [#allocation3], 0  ;;  %s266_s0 = inlined_call_operand.hbm [shape: f32[8,32], index: 0, kind: input, shape index: {}]   ;;  %s267_s1 = inlined_call_operand.hbm [shape: f32[4,32], index: 1, kind: input, shape index: {}]   ;;  %s268_s2 = inlined_call_operand.vmem [shape: f32[1,4], index: 2, kind: input, shape index: {}]   ;;  %s269_s3 = inlined_call_operand.vmem [shape: f32[8,4], index: 3, kind: output, shape index: {}]  }
   0x1   :  { %9 = vsyncpa [#allocation5], 0  ;;  %s209_s12 = smov [#allocation2]   ;;  %s210_s14 = smov [#allocation4]  }
   0x2   :  { %s16_s13 = sshll.u32 %s209_s12, 4  ;;  %s26_s15 = sshll.u32 %s210_s14, 4  ;;  %s17_s13 = int_to_ptr.vmem [resolvable:$true] %s16_s13  ;;  %s27_s15 = int_to_ptr.vmem [resolvable:$true] %s26_s15 }
   0x3   :  { %s161_s18 = scalar_lea.hbm %s266_s0, 128 }
   0x4   :  { %p162_p0 = scmp.ne.s32.totalorder %s266_s0, %s161_s18  ;;  %p165_p1 = scmp.lt.u32.totalorder %s161_s18, %s266_s0 }
   0x6   :  { %p167_p2 = pnand %p165_p1, %p162_p0 }
   0x8   :  { %170 = shalt.err (!%p167_p2)
}
   0x9   :  { %s171_s23 = scalar_lea.vmem %s17_s13, 128  ;;  %p176_p4 = scmp.lt.s32.totalorder %s17_s13, %s17_s13 }
   0xa   :  { %p172_p3 = scmp.ne.s32.totalorder %s17_s13, %s171_s23  ;;  %p177_p5 = scmp.lt.s32.totalorder %s171_s23, %s171_s23 }
   0xc   :  { %p178_p6 = por %p177_p5, %p176_p4 }
   0xe   :  { %p179_p7 = pnand %p178_p6, %p172_p3 }
  0x10   :  { %182 = shalt.err (!%p179_p7)
}
  0x11   :  { %19 = dma.hbm_to_vmem [thread:$0]  %s266_s0, 128, %s17_s13, [#allocation3]  }
  0x12   :  { %s183_s28 = scalar_lea.hbm %s267_s1, 64 }
  0x13   :  { %p184_p8 = scmp.ne.s32.totalorder %s267_s1, %s183_s28  ;;  %p187_p9 = scmp.lt.u32.totalorder %s183_s28, %s267_s1 }
  0x15   :  { %p189_p10 = pnand %p187_p9, %p184_p8 }
  0x17   :  { %192 = shalt.err (!%p189_p10)
}
  0x18   :  { %s193_s6 = scalar_lea.vmem %s27_s15, 64  ;;  %p198_p12 = scmp.lt.s32.totalorder %s27_s15, %s27_s15 }
  0x19   :  { %p194_p11 = scmp.ne.s32.totalorder %s27_s15, %s193_s6  ;;  %p199_p13 = scmp.lt.s32.totalorder %s193_s6, %s193_s6 }
  0x1b   :  { %p200_p0 = por %p199_p13, %p198_p12 }
  0x1d   :  { %p201_p1 = pnand %p200_p0, %p194_p11 }
  0x1f   :  { %204 = shalt.err (!%p201_p1)
}
  0x20   :  { %29 = dma.hbm_to_vmem [thread:$0]  %s267_s1, 64, %s27_s15, [#allocation5]  }
  0x21   :  { %205 = dma.done.wait [#allocation3], 128  }
  0x22   :  { %206 = vsyncadd [#allocation3], 4294967168 }
  0x23   :  { %207 = dma.done.wait [#allocation5], 64  }
  0x24   :  { %208 = vsyncadd [#allocation5], 4294967232  ;;  %v211_v0 = vmov 0.0   ;;  %vm212_vm0 = vmmov 0   ;;  %vm47_vm1 = vcmask 261120   ;;  %v38_v2 = vld [vmem:[#allocation2] sm:$0xff] }
  0x25   :  { %148 = vmatprep.subr.mxu0 %v211_v0  ;;  %150 = vmatprep.mubr.msk.f32.mxu0 %vm212_vm0, %v211_v0  ;;  %v39_v1 = vld [vmem:[#allocation4] sm:$0xf]  ;;  %v143_v3 = vld [vmem:[%s268_s2] ss:$0 sm:$0xff]  ;;  %vm124_vm2 = vcmask 31744  }
  0x26   :  { %149 = vmatpush3.xpose.msk.msra.mxu0 %vm47_vm1, %v39_v1 }
  0x29   :  { %151 = vmatmul.mubr.msk.f32.vlgmr.msra.gmra.mrb[0].mxu0 %vm47_vm1, %v38_v2 }
  0xfc   :  { %v120_v4 = vpop.f32.mrb[0].mxu0 }
  0xfd   :  { %v121_v5 = vadd.f32 %v143_v3, %v120_v4  ;;  %v152_v6 = vpop.f32.mrb[1].mxu0 }
  0xff   :  { %v125_v7 = vsel %vm124_vm2, %v121_v5, -inf }
 0x100   :  { %126 = vmax.xlane.f32.xlu0 %v125_v7 }
 0x18d   :  { %v127_v8 = vpop.xlane.xlu0 %126 }
 0x18e   :  { %v128_v9 = vsub.f32 %v121_v5, %v127_v8 }
 0x190   :  { %v129_v10 = vmul.f32 1.442695, %v128_v9 }
 0x192   :  { %157 = vpow2.f32 %v129_v10 }
 0x19c   :  { %v158_v11 = vpop.eup %157 }
 0x19d   :  { %v131_v12 = vsel %vm124_vm2, %v158_v11, 0.0 }
 0x19e   :  { %132 = vadd.xlane.f32.xlu0 %v131_v12 }
 0x22b   :  { %v133_v13 = vpop.xlane.xlu0 %132 }
 0x22c   :  { %159 = vrcp.f32 %v133_v13 }
 0x236   :  { %v160_v14 = vpop.eup %159 }
 0x237   :  { %v135_v15 = vmul.f32 %v160_v14, %v158_v11 }
 0x239   :  { %136 = vst.msk [vmem:[%s269_s3] sm:$0xff] %vm124_vm2, %v135_v15 }
 0x23a   :  { %141 = vsyncpa [#allocation3], 1 }
 0x23b   :  { %142 = vsyncpa [#allocation5], 1 }

</bundles_post_ra>
